<compile_context>
chip_gen: v7x
topology: tpu7x:2x2x1
jax: 0.10.0
libtpu: 0.0.40
codegen_flags: <defaults>
</compile_context>

<pallas_src>
import jax
import jax.numpy as jnp
from jax.experimental import pallas as pl
from jax.experimental.pallas import tpu as pltpu


def _decoder_kernel(ids_ref, h_ref, ctx_ref, emb_tbl_ref,
                    wih_e_ref, wih_c_ref, whh_ref,
                    b_rzn_ref, b_hn_ref,
                    wfc_e_ref, wfc_h_ref, wfc_c_ref, bfc_ref,
                    pred_ref, hnew_ref):
    h = h_ref[...]              # [B, H]
    ctx = ctx_ref[...]          # [B, H]
    B = h.shape[0]
    O = emb_tbl_ref.shape[0]

    # --- In-kernel embedding lookup: one-hot @ table on the MXU (exact) ------
    ids = ids_ref[...]                                              # [B, 1] int32
    vocab_iota = jax.lax.broadcasted_iota(jnp.int32, (B, O), 1)     # [B, O]
    one_hot = (vocab_iota == ids).astype(jnp.float32)               # [B, O]
    emb = jnp.dot(one_hot, emb_tbl_ref[...],
                  preferred_element_type=jnp.float32)               # [B, E]

    # --- GRU gate pre-activations, gate-major, concat-free --------------------
    # PyTorch gate order r, z, n.  Biases: b_rzn[0]=b_ir+b_hr, b_rzn[1]=b_iz+b_hz,
    # b_rzn[2]=b_in, b_hn = b_hn (must stay inside the r* term).
    def gate_x(g):
        return (jnp.dot(emb, wih_e_ref[g], preferred_element_type=jnp.float32)
                + jnp.dot(ctx, wih_c_ref[g], preferred_element_type=jnp.float32))

    def gate_h(g):
        return jnp.dot(h, whh_ref[g], preferred_element_type=jnp.float32)

    r = jax.nn.sigmoid(gate_x(0) + gate_h(0) + b_rzn_ref[0])
    z = jax.nn.sigmoid(gate_x(1) + gate_h(1) + b_rzn_ref[1])
    n = jnp.tanh(gate_x(2) + b_rzn_ref[2] + r * (gate_h(2) + b_hn_ref[...]))
    h_new = (1.0 - z) * n + z * h                                    # [B, H]

    # --- fc_out( cat(embedded, h', context) ) as three partial matmuls --------
    pred_ref[...] = (jnp.dot(emb, wfc_e_ref[...], preferred_element_type=jnp.float32)
                     + jnp.dot(h_new, wfc_h_ref[...], preferred_element_type=jnp.float32)
                     + jnp.dot(ctx, wfc_c_ref[...], preferred_element_type=jnp.float32)
                     + bfc_ref[...])
    hnew_ref[...] = h_new


def prepare_params(params):
    """One-time conversion of PyTorch-layout params to kernel layout.

    Runs outside the per-token hot path: transposes to [in, out], gate-major
    stacking [3, in, H], bias combines, and weight slab splits (concat removal).
    """
    emb_table = params["embedding"]                    # [O, E]
    E = emb_table.shape[1]
    H = params["w_hh"].shape[1]

    w_ih = params["w_ih"]                              # [3H, E+H]
    w_hh = params["w_hh"]                              # [3H, H]
    b_ih = params["b_ih"]                              # [3H]
    b_hh = params["b_hh"]                              # [3H]
    fc_w = params["fc_w"]                              # [O, E+2H]

    wih_g = w_ih.reshape(3, H, E + H)                  # [gate, out, in]
    wih_e = jnp.transpose(wih_g[:, :, :E], (0, 2, 1))  # [3, E, H]
    wih_c = jnp.transpose(wih_g[:, :, E:], (0, 2, 1))  # [3, H, H]
    whh = jnp.transpose(w_hh.reshape(3, H, H), (0, 2, 1))  # [3, H, H]

    bih = b_ih.reshape(3, 1, H)
    bhh = b_hh.reshape(3, 1, H)
    b_rzn = jnp.concatenate([bih[0:2] + bhh[0:2], bih[2:3]], axis=0)  # [3, 1, H]
    b_hn = bhh[2]                                       # [1, H]

    wfc_e = fc_w[:, :E].T                               # [E, O]
    wfc_h = fc_w[:, E:E + H].T                          # [H, O]
    wfc_c = fc_w[:, E + H:].T                           # [H, O]
    bfc = params["fc_b"].reshape(1, -1)                 # [1, O]

    return {
        "emb_table": emb_table,
        "wih_e": wih_e, "wih_c": wih_c, "whh": whh,
        "b_rzn": b_rzn, "b_hn": b_hn,
        "wfc_e": wfc_e, "wfc_h": wfc_h, "wfc_c": wfc_c, "bfc": bfc,
    }


def decoder_forward(input_ids, hidden, context, prep):
    """input_ids: [B] int32, hidden/context: [1, B, H]. Returns (pred [B,O], hidden' [1,B,H])."""
    B = input_ids.shape[0]
    H = hidden.shape[-1]
    O = prep["emb_table"].shape[0]

    ids2d = input_ids.reshape(B, 1).astype(jnp.int32)   # [B, 1] for in-kernel one-hot
    h0 = hidden[0]                                      # [B, H]
    ctx = context[0]                                    # [B, H]

    vmem = pl.BlockSpec(memory_space=pltpu.MemorySpace.VMEM)
    pred, h_new = pl.pallas_call(
        _decoder_kernel,
        out_shape=(jax.ShapeDtypeStruct((B, O), jnp.float32),
                   jax.ShapeDtypeStruct((B, H), jnp.float32)),
        in_specs=[vmem] * 13,
        out_specs=(vmem, vmem),
    )(ids2d, h0, ctx,
      prep["emb_table"], prep["wih_e"], prep["wih_c"], prep["whh"],
      prep["b_rzn"], prep["b_hn"],
      prep["wfc_e"], prep["wfc_h"], prep["wfc_c"], prep["bfc"])

    # API-boundary only: restore the [1, B, H] layer dim expected by the module.
    return pred, h_new[None, :, :]


def init_params(key, output_dim, emb_dim, hid_dim):
    ks = jax.random.split(key, 7)
    scale = 0.1
    return {
        "embedding": scale * jax.random.normal(ks[0], (output_dim, emb_dim), jnp.float32),
        "w_ih": scale * jax.random.normal(ks[1], (3 * hid_dim, emb_dim + hid_dim), jnp.float32),
        "w_hh": scale * jax.random.normal(ks[2], (3 * hid_dim, hid_dim), jnp.float32),
        "b_ih": scale * jax.random.normal(ks[3], (3 * hid_dim,), jnp.float32),
        "b_hh": scale * jax.random.normal(ks[4], (3 * hid_dim,), jnp.float32),
        "fc_w": scale * jax.random.normal(ks[5], (output_dim, emb_dim + 2 * hid_dim), jnp.float32),
        "fc_b": scale * jax.random.normal(ks[6], (output_dim,), jnp.float32),
    }


def reference_forward(input_ids, hidden, context, params):
    """Pure-JAX reference matching PyTorch GRU/Linear semantics (eval-mode dropout)."""
    emb = jnp.take(params["embedding"], input_ids, axis=0)
    h = hidden[0]
    ctx = context[0]
    H = h.shape[1]
    x = jnp.concatenate([emb, ctx], axis=1)
    gx = x @ params["w_ih"].T + params["b_ih"]
    gh = h @ params["w_hh"].T + params["b_hh"]
    r = jax.nn.sigmoid(gx[:, :H] + gh[:, :H])
    z = jax.nn.sigmoid(gx[:, H:2 * H] + gh[:, H:2 * H])
    n = jnp.tanh(gx[:, 2 * H:] + r * gh[:, 2 * H:])
    h_new = (1.0 - z) * n + z * h
    out = jnp.concatenate([emb, h_new, ctx], axis=1)
    pred = out @ params["fc_w"].T + params["fc_b"]
    return pred, h_new[None]


if __name__ == "__main__":
    OUTPUT_DIM = 32   # vocab size
    EMB_DIM = 16
    HID_DIM = 32
    BATCH = 8

    key = jax.random.PRNGKey(0)
    k_par, k_in, k_h, k_c = jax.random.split(key, 4)

    params = init_params(k_par, OUTPUT_DIM, EMB_DIM, HID_DIM)
    prep = prepare_params(params)          # one-time layout conversion (not per step)

    input_ids = jax.random.randint(k_in, (BATCH,), 0, OUTPUT_DIM, dtype=jnp.int32)
    hidden = jax.random.normal(k_h, (1, BATCH, HID_DIM), jnp.float32)
    context = jax.random.normal(k_c, (1, BATCH, HID_DIM), jnp.float32)

    step = jax.jit(decoder_forward)
    pred, h_new = step(input_ids, hidden, context, prep)
    jax.block_until_ready((pred, h_new))

    # Sanity check against pure-JAX reference.
    pred_ref, h_ref = reference_forward(input_ids, hidden, context, params)
    assert jnp.allclose(pred, pred_ref, atol=1e-5, rtol=1e-5)
    assert jnp.allclose(h_new, h_ref, atol=1e-5, rtol=1e-5)
    assert pred.shape == (BATCH, OUTPUT_DIM) and h_new.shape == (1, BATCH, HID_DIM)

    print("KERNEL_OK")
</pallas_src>

<mosaic_0001>
module attributes {stable_mosaic.version = 11 : i64} {
  func.func @_decoder_kernel(%arg0: memref<8x1xi32, #tpu.memory_space<vmem>>, %arg1: memref<8x32xf32, #tpu.memory_space<vmem>>, %arg2: memref<8x32xf32, #tpu.memory_space<vmem>>, %arg3: memref<32x16xf32, #tpu.memory_space<vmem>>, %arg4: memref<3x16x32xf32, #tpu.memory_space<vmem>>, %arg5: memref<3x32x32xf32, #tpu.memory_space<vmem>>, %arg6: memref<3x32x32xf32, #tpu.memory_space<vmem>>, %arg7: memref<3x1x32xf32, #tpu.memory_space<vmem>>, %arg8: memref<1x32xf32, #tpu.memory_space<vmem>>, %arg9: memref<16x32xf32, #tpu.memory_space<vmem>>, %arg10: memref<32x32xf32, #tpu.memory_space<vmem>>, %arg11: memref<32x32xf32, #tpu.memory_space<vmem>>, %arg12: memref<1x32xf32, #tpu.memory_space<vmem>>, %arg13: memref<8x32xf32, #tpu.memory_space<vmem>>, %arg14: memref<8x32xf32, #tpu.memory_space<vmem>>) attributes {dimension_semantics = [], scalar_prefetch = 0 : i64, scratch_operands = 0 : i64, tpu.core_type = #tpu.core_type<tc>} {
    %c0 = arith.constant 0 : index
    %c0_0 = arith.constant 0 : index
    %0 = vector.load %arg1[%c0, %c0_0] : memref<8x32xf32, #tpu.memory_space<vmem>>, vector<8x32xf32>
    %c0_1 = arith.constant 0 : index
    %c0_2 = arith.constant 0 : index
    %1 = vector.load %arg2[%c0_1, %c0_2] : memref<8x32xf32, #tpu.memory_space<vmem>>, vector<8x32xf32>
    %c0_3 = arith.constant 0 : index
    %c0_4 = arith.constant 0 : index
    %2 = vector.load %arg0[%c0_3, %c0_4] : memref<8x1xi32, #tpu.memory_space<vmem>>, vector<8x1xi32>
    %3 = tpu.iota {dimensions = array<i32: 1>} : vector<8x32xi32>
    %4 = vector.broadcast %2 : vector<8x1xi32> to vector<8x32xi32>
    %5 = arith.cmpi eq, %3, %4 : vector<8x32xi32>
    %6 = arith.extui %5 : vector<8x32xi1> to vector<8x32xi32>
    %7 = arith.sitofp %6 : vector<8x32xi32> to vector<8x32xf32>
    %c0_5 = arith.constant 0 : index
    %c0_6 = arith.constant 0 : index
    %8 = vector.load %arg3[%c0_5, %c0_6] : memref<32x16xf32, #tpu.memory_space<vmem>>, vector<32x16xf32>
    %cst = arith.constant dense<0.000000e+00> : vector<8x16xf32>
    %9 = tpu.matmul %7, %8, %cst {dimension_numbers = #tpu.dot_dimension_numbers<[1], [0], [0], [1], [0, 0, 1, 1], [], []>} : vector<8x32xf32>, vector<32x16xf32>, vector<8x16xf32> -> vector<8x16xf32>
    %c0_7 = arith.constant 0 : index
    %c0_8 = arith.constant 0 : index
    %c0_9 = arith.constant 0 : index
    %10 = vector.load %arg4[%c0_7, %c0_8, %c0_9] : memref<3x16x32xf32, #tpu.memory_space<vmem>>, vector<1x16x32xf32>
    %11 = vector.shape_cast %10 : vector<1x16x32xf32> to vector<16x32xf32>
    %cst_10 = arith.constant dense<0.000000e+00> : vector<8x32xf32>
    %12 = tpu.matmul %9, %11, %cst_10 {dimension_numbers = #tpu.dot_dimension_numbers<[1], [0], [0], [1], [0, 0, 1, 1], [], []>} : vector<8x16xf32>, vector<16x32xf32>, vector<8x32xf32> -> vector<8x32xf32>
    %c0_11 = arith.constant 0 : index
    %c0_12 = arith.constant 0 : index
    %c0_13 = arith.constant 0 : index
    %13 = vector.load %arg5[%c0_11, %c0_12, %c0_13] : memref<3x32x32xf32, #tpu.memory_space<vmem>>, vector<1x32x32xf32>
    %14 = vector.shape_cast %13 : vector<1x32x32xf32> to vector<32x32xf32>
    %cst_14 = arith.constant dense<0.000000e+00> : vector<8x32xf32>
    %15 = tpu.matmul %1, %14, %cst_14 {dimension_numbers = #tpu.dot_dimension_numbers<[1], [0], [0], [1], [0, 0, 1, 1], [], []>} : vector<8x32xf32>, vector<32x32xf32>, vector<8x32xf32> -> vector<8x32xf32>
    %16 = arith.addf %12, %15 : vector<8x32xf32>
    %c0_15 = arith.constant 0 : index
    %c0_16 = arith.constant 0 : index
    %c0_17 = arith.constant 0 : index
    %17 = vector.load %arg6[%c0_15, %c0_16, %c0_17] : memref<3x32x32xf32, #tpu.memory_space<vmem>>, vector<1x32x32xf32>
    %18 = vector.shape_cast %17 : vector<1x32x32xf32> to vector<32x32xf32>
    %cst_18 = arith.constant dense<0.000000e+00> : vector<8x32xf32>
    %19 = tpu.matmul %0, %18, %cst_18 {dimension_numbers = #tpu.dot_dimension_numbers<[1], [0], [0], [1], [0, 0, 1, 1], [], []>} : vector<8x32xf32>, vector<32x32xf32>, vector<8x32xf32> -> vector<8x32xf32>
    %20 = arith.addf %16, %19 : vector<8x32xf32>
    %c0_19 = arith.constant 0 : index
    %c0_20 = arith.constant 0 : index
    %c0_21 = arith.constant 0 : index
    %21 = vector.load %arg7[%c0_19, %c0_20, %c0_21] : memref<3x1x32xf32, #tpu.memory_space<vmem>>, vector<1x1x32xf32>
    %22 = vector.shape_cast %21 : vector<1x1x32xf32> to vector<1x32xf32>
    %23 = vector.broadcast %22 : vector<1x32xf32> to vector<8x32xf32>
    %24 = arith.addf %20, %23 : vector<8x32xf32>
    %25 = arith.negf %24 : vector<8x32xf32>
    %26 = math.exp %25 : vector<8x32xf32>
    %cst_22 = arith.constant 1.000000e+00 : f32
    %27 = vector.broadcast %cst_22 : f32 to vector<8x32xf32>
    %28 = arith.addf %27, %26 : vector<8x32xf32>
    %29 = arith.divf %27, %28 : vector<8x32xf32>
    %c1 = arith.constant 1 : index
    %c0_23 = arith.constant 0 : index
    %c0_24 = arith.constant 0 : index
    %30 = vector.load %arg4[%c1, %c0_23, %c0_24] : memref<3x16x32xf32, #tpu.memory_space<vmem>>, vector<1x16x32xf32>
    %31 = vector.shape_cast %30 : vector<1x16x32xf32> to vector<16x32xf32>
    %cst_25 = arith.constant dense<0.000000e+00> : vector<8x32xf32>
    %32 = tpu.matmul %9, %31, %cst_25 {dimension_numbers = #tpu.dot_dimension_numbers<[1], [0], [0], [1], [0, 0, 1, 1], [], []>} : vector<8x16xf32>, vector<16x32xf32>, vector<8x32xf32> -> vector<8x32xf32>
    %c1_26 = arith.constant 1 : index
    %c0_27 = arith.constant 0 : index
    %c0_28 = arith.constant 0 : index
    %33 = vector.load %arg5[%c1_26, %c0_27, %c0_28] : memref<3x32x32xf32, #tpu.memory_space<vmem>>, vector<1x32x32xf32>
    %34 = vector.shape_cast %33 : vector<1x32x32xf32> to vector<32x32xf32>
    %cst_29 = arith.constant dense<0.000000e+00> : vector<8x32xf32>
    %35 = tpu.matmul %1, %34, %cst_29 {dimension_numbers = #tpu.dot_dimension_numbers<[1], [0], [0], [1], [0, 0, 1, 1], [], []>} : vector<8x32xf32>, vector<32x32xf32>, vector<8x32xf32> -> vector<8x32xf32>
    %36 = arith.addf %32, %35 : vector<8x32xf32>
    %c1_30 = arith.constant 1 : index
    %c0_31 = arith.constant 0 : index
    %c0_32 = arith.constant 0 : index
    %37 = vector.load %arg6[%c1_30, %c0_31, %c0_32] : memref<3x32x32xf32, #tpu.memory_space<vmem>>, vector<1x32x32xf32>
    %38 = vector.shape_cast %37 : vector<1x32x32xf32> to vector<32x32xf32>
    %cst_33 = arith.constant dense<0.000000e+00> : vector<8x32xf32>
    %39 = tpu.matmul %0, %38, %cst_33 {dimension_numbers = #tpu.dot_dimension_numbers<[1], [0], [0], [1], [0, 0, 1, 1], [], []>} : vector<8x32xf32>, vector<32x32xf32>, vector<8x32xf32> -> vector<8x32xf32>
    %40 = arith.addf %36, %39 : vector<8x32xf32>
    %c1_34 = arith.constant 1 : index
    %c0_35 = arith.constant 0 : index
    %c0_36 = arith.constant 0 : index
    %41 = vector.load %arg7[%c1_34, %c0_35, %c0_36] : memref<3x1x32xf32, #tpu.memory_space<vmem>>, vector<1x1x32xf32>
    %42 = vector.shape_cast %41 : vector<1x1x32xf32> to vector<1x32xf32>
    %43 = vector.broadcast %42 : vector<1x32xf32> to vector<8x32xf32>
    %44 = arith.addf %40, %43 : vector<8x32xf32>
    %45 = arith.negf %44 : vector<8x32xf32>
    %46 = math.exp %45 : vector<8x32xf32>
    %cst_37 = arith.constant 1.000000e+00 : f32
    %47 = vector.broadcast %cst_37 : f32 to vector<8x32xf32>
    %48 = arith.addf %47, %46 : vector<8x32xf32>
    %49 = arith.divf %47, %48 : vector<8x32xf32>
    %c2 = arith.constant 2 : index
    %c0_38 = arith.constant 0 : index
    %c0_39 = arith.constant 0 : index
    %50 = vector.load %arg4[%c2, %c0_38, %c0_39] : memref<3x16x32xf32, #tpu.memory_space<vmem>>, vector<1x16x32xf32>
    %51 = vector.shape_cast %50 : vector<1x16x32xf32> to vector<16x32xf32>
    %cst_40 = arith.constant dense<0.000000e+00> : vector<8x32xf32>
    %52 = tpu.matmul %9, %51, %cst_40 {dimension_numbers = #tpu.dot_dimension_numbers<[1], [0], [0], [1], [0, 0, 1, 1], [], []>} : vector<8x16xf32>, vector<16x32xf32>, vector<8x32xf32> -> vector<8x32xf32>
    %c2_41 = arith.constant 2 : index
    %c0_42 = arith.constant 0 : index
    %c0_43 = arith.constant 0 : index
    %53 = vector.load %arg5[%c2_41, %c0_42, %c0_43] : memref<3x32x32xf32, #tpu.memory_space<vmem>>, vector<1x32x32xf32>
    %54 = vector.shape_cast %53 : vector<1x32x32xf32> to vector<32x32xf32>
    %cst_44 = arith.constant dense<0.000000e+00> : vector<8x32xf32>
    %55 = tpu.matmul %1, %54, %cst_44 {dimension_numbers = #tpu.dot_dimension_numbers<[1], [0], [0], [1], [0, 0, 1, 1], [], []>} : vector<8x32xf32>, vector<32x32xf32>, vector<8x32xf32> -> vector<8x32xf32>
    %56 = arith.addf %52, %55 : vector<8x32xf32>
    %c2_45 = arith.constant 2 : index
    %c0_46 = arith.constant 0 : index
    %c0_47 = arith.constant 0 : index
    %57 = vector.load %arg7[%c2_45, %c0_46, %c0_47] : memref<3x1x32xf32, #tpu.memory_space<vmem>>, vector<1x1x32xf32>
    %58 = vector.shape_cast %57 : vector<1x1x32xf32> to vector<1x32xf32>
    %59 = vector.broadcast %58 : vector<1x32xf32> to vector<8x32xf32>
    %60 = arith.addf %56, %59 : vector<8x32xf32>
    %c2_48 = arith.constant 2 : index
    %c0_49 = arith.constant 0 : index
    %c0_50 = arith.constant 0 : index
    %61 = vector.load %arg6[%c2_48, %c0_49, %c0_50] : memref<3x32x32xf32, #tpu.memory_space<vmem>>, vector<1x32x32xf32>
    %62 = vector.shape_cast %61 : vector<1x32x32xf32> to vector<32x32xf32>
    %cst_51 = arith.constant dense<0.000000e+00> : vector<8x32xf32>
    %63 = tpu.matmul %0, %62, %cst_51 {dimension_numbers = #tpu.dot_dimension_numbers<[1], [0], [0], [1], [0, 0, 1, 1], [], []>} : vector<8x32xf32>, vector<32x32xf32>, vector<8x32xf32> -> vector<8x32xf32>
    %c0_52 = arith.constant 0 : index
    %c0_53 = arith.constant 0 : index
    %64 = vector.load %arg8[%c0_52, %c0_53] : memref<1x32xf32, #tpu.memory_space<vmem>>, vector<1x32xf32>
    %65 = vector.broadcast %64 : vector<1x32xf32> to vector<8x32xf32>
    %66 = arith.addf %63, %65 : vector<8x32xf32>
    %67 = arith.mulf %29, %66 : vector<8x32xf32>
    %68 = arith.addf %60, %67 : vector<8x32xf32>
    %69 = math.tanh %68 : vector<8x32xf32>
    %cst_54 = arith.constant 1.000000e+00 : f32
    %70 = vector.broadcast %cst_54 : f32 to vector<8x32xf32>
    %71 = arith.subf %70, %49 : vector<8x32xf32>
    %72 = arith.mulf %71, %69 : vector<8x32xf32>
    %73 = arith.mulf %49, %0 : vector<8x32xf32>
    %74 = arith.addf %72, %73 : vector<8x32xf32>
    %c0_55 = arith.constant 0 : index
    %c0_56 = arith.constant 0 : index
    %75 = vector.load %arg9[%c0_55, %c0_56] : memref<16x32xf32, #tpu.memory_space<vmem>>, vector<16x32xf32>
    %cst_57 = arith.constant dense<0.000000e+00> : vector<8x32xf32>
    %76 = tpu.matmul %9, %75, %cst_57 {dimension_numbers = #tpu.dot_dimension_numbers<[1], [0], [0], [1], [0, 0, 1, 1], [], []>} : vector<8x16xf32>, vector<16x32xf32>, vector<8x32xf32> -> vector<8x32xf32>
    %c0_58 = arith.constant 0 : index
    %c0_59 = arith.constant 0 : index
    %77 = vector.load %arg10[%c0_58, %c0_59] : memref<32x32xf32, #tpu.memory_space<vmem>>, vector<32x32xf32>
    %cst_60 = arith.constant dense<0.000000e+00> : vector<8x32xf32>
    %78 = tpu.matmul %74, %77, %cst_60 {dimension_numbers = #tpu.dot_dimension_numbers<[1], [0], [0], [1], [0, 0, 1, 1], [], []>} : vector<8x32xf32>, vector<32x32xf32>, vector<8x32xf32> -> vector<8x32xf32>
    %79 = arith.addf %76, %78 : vector<8x32xf32>
    %c0_61 = arith.constant 0 : index
    %c0_62 = arith.constant 0 : index
    %80 = vector.load %arg11[%c0_61, %c0_62] : memref<32x32xf32, #tpu.memory_space<vmem>>, vector<32x32xf32>
    %cst_63 = arith.constant dense<0.000000e+00> : vector<8x32xf32>
    %81 = tpu.matmul %1, %80, %cst_63 {dimension_numbers = #tpu.dot_dimension_numbers<[1], [0], [0], [1], [0, 0, 1, 1], [], []>} : vector<8x32xf32>, vector<32x32xf32>, vector<8x32xf32> -> vector<8x32xf32>
    %82 = arith.addf %79, %81 : vector<8x32xf32>
    %c0_64 = arith.constant 0 : index
    %c0_65 = arith.constant 0 : index
    %83 = vector.load %arg12[%c0_64, %c0_65] : memref<1x32xf32, #tpu.memory_space<vmem>>, vector<1x32xf32>
    %84 = vector.broadcast %83 : vector<1x32xf32> to vector<8x32xf32>
    %85 = arith.addf %82, %84 : vector<8x32xf32>
    %c0_66 = arith.constant 0 : index
    %c0_67 = arith.constant 0 : index
    %86 = vector.load %arg13[%c0_66, %c0_67] : memref<8x32xf32, #tpu.memory_space<vmem>>, vector<8x32xf32>
    tpu.vector_store %arg13[%c0_66, %c0_67], %85 {strides = array<i32>} : memref<8x32xf32, #tpu.memory_space<vmem>>, vector<8x32xf32>,
    %c0_68 = arith.constant 0 : index
    %c0_69 = arith.constant 0 : index
    %87 = vector.load %arg14[%c0_68, %c0_69] : memref<8x32xf32, #tpu.memory_space<vmem>>, vector<8x32xf32>
    tpu.vector_store %arg14[%c0_68, %c0_69], %74 {strides = array<i32>} : memref<8x32xf32, #tpu.memory_space<vmem>>, vector<8x32xf32>,
    return
  }
}

</mosaic_0001>

<bundles_post_ra>
// kernel: decoder_forward.1
= control target key start
LH: loop header
LB: loop body
LE: loop exit
PB: predicated region body
PF: predicated region fallthrough
CT: control target
= control target key end

     0   :  { %20 = vsyncpa [#allocation3], 0  ;;  %s2055_s0 = inlined_call_operand.vmem [shape: s32[8,1], index: 0, kind: input, shape index: {}]   ;;  %s2056_s1 = inlined_call_operand.vmem [shape: f32[8,32], index: 1, kind: input, shape index: {}]   ;;  %s2057_s2 = inlined_call_operand.hbm [shape: f32[8,32], index: 2, kind: input, shape index: {}]   ;;  %s2058_s3 = inlined_call_operand.vmem [shape: f32[32,16], index: 3, kind: input, shape index: {}]   ;;  %s2059_s4 = inlined_call_operand.hbm [shape: f32[3,16,32], index: 4, kind: input, shape index: {}]   ;;  %s2060_s5 = inlined_call_operand.vmem [shape: f32[3,32,32], index: 5, kind: input, shape index: {}]   ;;  %s2061_s6 = inlined_call_operand.hbm [shape: f32[3,32,32], index: 6, kind: input, shape index: {}]   ;;  %s2062_s7 = inlined_call_operand.vmem [shape: f32[3,1,32], index: 7, kind: input, shape index: {}]   ;;  %s2063_s8 = inlined_call_operand.vmem [shape: f32[1,32], index: 8, kind: input, shape index: {}]   ;;  %s2064_s9 = inlined_call_operand.hbm [shape: f32[16,32], index: 9, kind: input, shape index: {}]   ;;  %s2065_s10 = inlined_call_operand.hbm [shape: f32[32,32], index: 10, kind: input, shape index: {}]   ;;  %s2066_s11 = inlined_call_operand.hbm [shape: f32[32,32], index: 11, kind: input, shape index: {}]   ;;  %s2067_s12 = inlined_call_operand.vmem [shape: f32[1,32], index: 12, kind: input, shape index: {}]   ;;  %s2068_s13 = inlined_call_operand.hbm [shape: f32[8,32], index: 13, kind: output, shape index: {0}]   ;;  %s2069_s14 = inlined_call_operand.hbm [shape: f32[8,32], index: 14, kind: output, shape index: {1}]  }
   0x1   :  { %21 = vsyncpa [#allocation6], 0 }
   0x2   :  { %22 = vsyncpa [#allocation9], 0 }
   0x3   :  { %23 = vsyncpa [#allocation12], 0 }
   0x4   :  { %24 = vsyncpa [#allocation4], 0 }
   0x5   :  { %25 = vsyncpa [#allocation15], 0  ;;  %s1707_s29 = smov [#allocation5]   ;;  %s1519_s17 = scalar_lea.hbm %s2059_s4, 768 }
   0x6   :  { %s47_s30 = sshll.u32 %s1707_s29, 4  ;;  %p1520_p0 = scmp.ne.s32.totalorder %s2059_s4, %s1519_s17  ;;  %s48_s30 = int_to_ptr.vmem [resolvable:$true] %s47_s30 }
   0x7   :  { %p1523_p1 = scmp.lt.u32.totalorder %s1519_s17, %s2059_s4 }
   0x9   :  { %p1525_p2 = pnand %p1523_p1, %p1520_p0 }
   0xb   :  { %1528 = shalt.err (!%p1525_p2)
}
   0xc   :  { %s1529_s22 = scalar_lea.vmem %s48_s30, 768  ;;  %p1534_p4 = scmp.lt.s32.totalorder %s48_s30, %s48_s30 }
   0xd   :  { %p1530_p3 = scmp.ne.s32.totalorder %s48_s30, %s1529_s22  ;;  %p1535_p5 = scmp.lt.s32.totalorder %s1529_s22, %s1529_s22 }
   0xf   :  { %p1536_p6 = por %p1535_p5, %p1534_p4 }
  0x11   :  { %p1537_p7 = pnand %p1536_p6, %p1530_p3 }
  0x13   :  { %1540 = shalt.err (!%p1537_p7)
}
  0x14   :  { %s1708_s23 = smov 128   ;;  %s1709_s24 = smov 8  }
  0x15   :  { %53 = dma.hbm_to_vmem [thread:$0]  %s2059_s4, 768, %s48_s30, [#allocation6], %s1708_s23, %s1708_s23, %s1709_s24  }
  0x16   :  { %s1710_s27 = smov [#allocation8]   ;;  %s1711_s29 = smov [#allocation2]  }
  0x17   :  { %s77_s28 = sshll.u32 %s1710_s27, 4  ;;  %s36_s15 = sshll.u32 %s1711_s29, 4  ;;  %s78_s28 = int_to_ptr.vmem [resolvable:$true] %s77_s28  ;;  %s37_s15 = int_to_ptr.vmem [resolvable:$true] %s36_s15 }
  0x18   :  { %s1541_s18 = scalar_lea.hbm %s2064_s9, 256 }
  0x19   :  { %p1542_p8 = scmp.ne.s32.totalorder %s2064_s9, %s1541_s18  ;;  %p1545_p9 = scmp.lt.u32.totalorder %s1541_s18, %s2064_s9 }
  0x1b   :  { %p1547_p10 = pnand %p1545_p9, %p1542_p8 }
  0x1d   :  { %1550 = shalt.err (!%p1547_p10)
}
  0x1e   :  { %s1551_s4 = scalar_lea.vmem %s78_s28, 256  ;;  %p1556_p12 = scmp.lt.s32.totalorder %s78_s28, %s78_s28 }
  0x1f   :  { %p1552_p11 = scmp.ne.s32.totalorder %s78_s28, %s1551_s4  ;;  %p1557_p13 = scmp.lt.s32.totalorder %s1551_s4, %s1551_s4 }
  0x21   :  { %p1558_p0 = por %p1557_p13, %p1556_p12 }
  0x23   :  { %p1559_p1 = pnand %p1558_p0, %p1552_p11 }
  0x25   :  { %1562 = shalt.err (!%p1559_p1)
}
  0x26   :  { %83 = dma.hbm_to_vmem [thread:$0]  %s2064_s9, 256, %s78_s28, [#allocation9], %s1708_s23, %s1708_s23, %s1709_s24  }
  0x27   :  { %s1563_s29 = scalar_lea.hbm %s2057_s2, 128 }
  0x28   :  { %p1564_p2 = scmp.ne.s32.totalorder %s2057_s2, %s1563_s29  ;;  %p1567_p3 = scmp.lt.u32.totalorder %s1563_s29, %s2057_s2 }
  0x2a   :  { %p1569_p4 = pnand %p1567_p3, %p1564_p2 }
  0x2c   :  { %1572 = shalt.err (!%p1569_p4)
}
  0x2d   :  { %s1573_s20 = scalar_lea.vmem %s37_s15, 128  ;;  %p1578_p6 = scmp.lt.s32.totalorder %s37_s15, %s37_s15 }
  0x2e   :  { %p1574_p5 = scmp.ne.s32.totalorder %s37_s15, %s1573_s20  ;;  %p1579_p7 = scmp.lt.s32.totalorder %s1573_s20, %s1573_s20 }
  0x30   :  { %p1580_p8 = por %p1579_p7, %p1578_p6 }
  0x32   :  { %p1581_p9 = pnand %p1580_p8, %p1574_p5 }
  0x34   :  { %1584 = shalt.err (!%p1581_p9)
}
  0x35   :  { %39 = dma.hbm_to_vmem [thread:$0]  %s2057_s2, 128, %s37_s15, [#allocation3]  }
  0x36   :  { %s1712_s21 = smov [#allocation7]   ;;  %s1713_s4 = smov [#allocation10]  }
  0x37   :  { %s61_s22 = sshll.u32 %s1712_s21, 4  ;;  %s89_s30 = sshll.u32 %s1713_s4, 4  ;;  %s62_s22 = int_to_ptr.vmem [resolvable:$true] %s61_s22  ;;  %s90_s30 = int_to_ptr.vmem [resolvable:$true] %s89_s30 }
  0x38   :  { %s1585_s27 = scalar_lea.hbm %s2061_s6, 1536 }
  0x39   :  { %p1586_p10 = scmp.ne.s32.totalorder %s2061_s6, %s1585_s27  ;;  %p1589_p11 = scmp.lt.u32.totalorder %s1585_s27, %s2061_s6 }
  0x3b   :  { %p1591_p12 = pnand %p1589_p11, %p1586_p10 }
  0x3d   :  { %1594 = shalt.err (!%p1591_p12)
}
  0x3e   :  { %s1595_s2 = scalar_lea.vmem %s62_s22, 1536  ;;  %p1600_p0 = scmp.lt.s32.totalorder %s62_s22, %s62_s22 }
  0x3f   :  { %p1596_p13 = scmp.ne.s32.totalorder %s62_s22, %s1595_s2  ;;  %p1601_p1 = scmp.lt.s32.totalorder %s1595_s2, %s1595_s2 }
  0x41   :  { %p1602_p2 = por %p1601_p1, %p1600_p0 }
  0x43   :  { %p1603_p3 = pnand %p1602_p2, %p1596_p13 }
  0x45   :  { %1606 = shalt.err (!%p1603_p3)
}
  0x46   :  { %67 = dma.hbm_to_vmem [thread:$0]  %s2061_s6, 1536, %s62_s22, [#allocation6], %s1708_s23, %s1708_s23, %s1709_s24  }
  0x47   :  { %s1607_s28 = scalar_lea.hbm %s2065_s10, 512 }
  0x48   :  { %p1608_p4 = scmp.ne.s32.totalorder %s2065_s10, %s1607_s28  ;;  %p1611_p5 = scmp.lt.u32.totalorder %s1607_s28, %s2065_s10 }
  0x4a   :  { %p1613_p6 = pnand %p1611_p5, %p1608_p4 }
  0x4c   :  { %1616 = shalt.err (!%p1613_p6)
}
  0x4d   :  { %s1617_s27 = scalar_lea.vmem %s90_s30, 512  ;;  %p1622_p8 = scmp.lt.s32.totalorder %s90_s30, %s90_s30 }
  0x4e   :  { %p1618_p7 = scmp.ne.s32.totalorder %s90_s30, %s1617_s27  ;;  %p1623_p9 = scmp.lt.s32.totalorder %s1617_s27, %s1617_s27 }
  0x50   :  { %p1624_p10 = por %p1623_p9, %p1622_p8 }
  0x52   :  { %p1625_p11 = pnand %p1624_p10, %p1618_p7 }
  0x54   :  { %1628 = shalt.err (!%p1625_p11)
}
  0x55   :  { %95 = dma.hbm_to_vmem [thread:$0]  %s2065_s10, 512, %s90_s30, [#allocation9], %s1708_s23, %s1708_s23, %s1709_s24  }
  0x56   :  { %s1714_s29 = smov [#allocation11]   ;;  %s1629_s2 = scalar_lea.hbm %s2066_s11, 512 }
  0x57   :  { %s101_s16 = sshll.u32 %s1714_s29, 4  ;;  %p1630_p12 = scmp.ne.s32.totalorder %s2066_s11, %s1629_s2  ;;  %s102_s16 = int_to_ptr.vmem [resolvable:$true] %s101_s16 }
  0x58   :  { %p1633_p13 = scmp.lt.u32.totalorder %s1629_s2, %s2066_s11 }
  0x5a   :  { %p1635_p0 = pnand %p1633_p13, %p1630_p12 }
  0x5c   :  { %1638 = shalt.err (!%p1635_p0)
}
  0x5d   :  { %s1639_s28 = scalar_lea.vmem %s102_s16, 512  ;;  %p1644_p2 = scmp.lt.s32.totalorder %s102_s16, %s102_s16 }
  0x5e   :  { %p1640_p1 = scmp.ne.s32.totalorder %s102_s16, %s1639_s28  ;;  %p1645_p3 = scmp.lt.s32.totalorder %s1639_s28, %s1639_s28 }
  0x60   :  { %p1646_p4 = por %p1645_p3, %p1644_p2 }
  0x62   :  { %p1647_p5 = pnand %p1646_p4, %p1640_p1 }
  0x64   :  { %1650 = shalt.err (!%p1647_p5)
}
  0x65   :  { %107 = dma.hbm_to_vmem [thread:$0]  %s2066_s11, 512, %s102_s16, [#allocation12], %s1708_s23, %s1708_s23, %s1709_s24  }
  0x66   :  { %1695 = dma.done.wait [#allocation3], 128  }
  0x67   :  { %1696 = vsyncadd [#allocation3], 4294967168 }
  0x68   :  { %1697 = dma.done.wait [#allocation6], 2304  }
  0x69   :  { %1698 = vsyncadd [#allocation6], 4294964992 }
  0x6a   :  { %1699 = dma.done.wait [#allocation9], 768  }
  0x6b   :  { %1700 = vsyncadd [#allocation9], 4294966528 }
  0x6c   :  { %1701 = dma.done.wait [#allocation12], 512  }
  0x6d   :  { %1702 = vsyncadd [#allocation12], 4294966784  ;;  %v1715_v0 = vmov 0   ;;  %v1716_v1 = vmov 0.0|0.0   ;;  %v130_v2 = vld [vmem:[%s2055_s0] sm:$0xff]  ;;  %v140_v4 = vld [vmem:[%s2058_s3 + $0x8] sm:$0xff]  ;;  %v131_v20 = vlaneseq }
  0x6e   :  { %1508 = vset.pattern.permute.xlu0 %v1715_v0  ;;  %1428 = vmatprep.subr.bf16.mxu0 %v1716_v1  ;;  %v139_v3 = vld [vmem:[%s2058_s3] sm:$0xff]  ;;  %v141_v6 = vld [vmem:[%s2058_s3 + $0x10] sm:$0xff]  ;;  %v142_v7 = vld [vmem:[%s2058_s3 + $0x18] sm:$0xff]  ;;  %vm1717_vm0 = vmmov 0   ;;  %v1718_v8 = vmov 0.0   ;;  %vm143_vm1 = vcmask 261120  }
  0x6f   :  { %1434 = vmatprep.subr.bf16.mxu1 %v1716_v1  ;;  %134 = vperm.xlu0 %1508, %v130_v2   ;;  %v1429_v5 = vpack.c.bf16 %v140_v4, %v139_v3  ;;  %v1432_v9 = vpack.c.bf16 %v142_v7, %v141_v6  ;;  %v219_v10 = vld [vmem:[%s2060_s5] sm:$0xff]  ;;  %v220_v11 = vld [vmem:[%s2060_s5 + $0x8] sm:$0xff]  ;;  %v221_v13 = vld [vmem:[%s2060_s5 + $0x10] sm:$0xff]  ;;  %v132_v21 = vand.u32 127, %v131_v20  ;;  %vm296_vm3 = vcmask 130048  }
  0x70   :  { %1309 = vmatprep.mubr.msk.f32.mxu0 %vm1717_vm0, %v1718_v8  ;;  %1320 = vmatprep.mubr.msk.f32.mxu1 %vm1717_vm0, %v1718_v8  ;;  %v1435_v12 = vpack.c.bf16 %v220_v11, %v219_v10  ;;  %v222_v14 = vld [vmem:[%s2060_s5 + $0x18] sm:$0xff]  ;;  %v217_v16 = vld [vmem:[#allocation5] sm:$0xff]  ;;  %v218_v17 = vld [vmem:[#allocation5 + $0x8] sm:$0xff] }
  0x71   :  { %1430 = vmatpush3.bf16.msra.mxu0 %v1429_v5  ;;  %v1438_v15 = vpack.c.bf16 %v222_v14, %v221_v13  ;;  %v1920_v18 = vld [vmem:[#allocation2] sm:$0xff]  ;;  %v1441_v19 = vpack.c.bf16 %v218_v17, %v217_v16  ;;  %v1221_v23 = vld [vmem:[%s2060_s5 + $0x28] sm:$0xff]  ;;  %v1222_v26 = vld [vmem:[%s2060_s5 + $0x30] sm:$0xff] }
  0x72   :  { %1431 = vmatprep.subr.bf16.mxu0 %v1716_v1  ;;  %1436 = vmatpush3.bf16.msra.mxu1 %v1435_v12  ;;  %v1220_v22 = vld [vmem:[%s2060_s5 + $0x20] sm:$0xff]  ;;  %v1223_v27 = vld [vmem:[%s2060_s5 + $0x38] sm:$0xff]  ;;  %v613_v33 = vld [vmem:[#allocation7 + $0x30] sm:$0xff] }
  0x73   :  { %1437 = vmatprep.subr.bf16.mxu1 %v1716_v1  ;;  %v1450_v25 = vpack.c.bf16 %v1221_v23, %v1220_v22  ;;  %v1453_v29 = vpack.c.bf16 %v1223_v27, %v1222_v26  ;;  %v611_v30 = vld [vmem:[#allocation7 + $0x20] sm:$0xff]  ;;  %v612_v31 = vld [vmem:[#allocation7 + $0x28] sm:$0xff]  ;;  %v614_v34 = vld [vmem:[#allocation7 + $0x38] sm:$0xff] }
  0x74   :  { %v1459_v32 = vpack.c.bf16 %v612_v31, %v611_v30  ;;  %v1462_v35 = vpack.c.bf16 %v614_v34, %v613_v33  ;;  %v702_v36 = vld [vmem:[#allocation5 + $0x20] sm:$0xff]  ;;  %v703_v37 = vld [vmem:[#allocation5 + $0x28] sm:$0xff]  ;;  %v1953_v38 = vld [vmem:[%s2056_s1] sm:$0xff] }
  0x75   :  { %1433 = vmatpush3.bf16.msra.mxu0 %v1432_v9  ;;  %v1471_v39 = vpack.c.bf16 %v703_v37, %v702_v36  ;;  %v370_v42 = vld [vmem:[#allocation7] sm:$0xff]  ;;  %v371_v43 = vld [vmem:[#allocation7 + $0x8] sm:$0xff]  ;;  %v372_v45 = vld [vmem:[#allocation7 + $0x10] sm:$0xff] }
  0x76   :  { %1449 = vmatprep.subr.bf16.mxu0 %v1716_v1  ;;  %1439 = vmatpush3.bf16.msra.mxu1 %v1438_v15  ;;  %v1444_v44 = vpack.c.bf16 %v371_v43, %v370_v42  ;;  %v373_v46 = vld [vmem:[#allocation7 + $0x18] sm:$0xff]  ;;  %v463_v50 = vld [vmem:[#allocation5 + $0x10] sm:$0xff]  ;;  %v464_v51 = vld [vmem:[#allocation5 + $0x18] sm:$0xff] }
  0x77   :  { %1440 = vmatprep.subr.bf16.mxu1 %v1716_v1  ;;  %v1447_v49 = vpack.c.bf16 %v373_v46, %v372_v45  ;;  %v1456_v52 = vpack.c.bf16 %v464_v51, %v463_v50  ;;  %v1230_v53 = vld [vmem:[%s2060_s5 + $0x40] sm:$0xff]  ;;  %v1231_v54 = vld [vmem:[%s2060_s5 + $0x48] sm:$0xff]  ;;  %v1232_v58 = vld [vmem:[%s2060_s5 + $0x50] sm:$0xff] }
  0x78   :  { %v1465_v57 = vpack.c.bf16 %v1231_v54, %v1230_v53  ;;  %v1233_v59 = vld [vmem:[%s2060_s5 + $0x58] sm:$0xff]  ;;  %v860_v62 = vld [vmem:[#allocation7 + $0x48] sm:$0xff]  ;;  %v861_v3 = vld [vmem:[#allocation7 + $0x50] sm:$0xff] }
  0x79   :  { %1321 = vmatmul.mubr.msk.f32.vlgmr.msra.gmra.mrb[0].mxu1 %vm143_vm1, %v1920_v18  ;;  %v1468_v60 = vpack.c.bf16 %v1233_v59, %v1232_v58  ;;  %v859_v61 = vld [vmem:[#allocation7 + $0x40] sm:$0xff]  ;;  %v862_v4 = vld [vmem:[#allocation7 + $0x58] sm:$0xff]  ;;  %v948_v7 = vld [vmem:[#allocation8 + $0x8] sm:$0xff] }
  0x7a   :  { %1442 = vmatpush3.bf16.msra.mxu1 %v1441_v19  ;;  %1327 = vmatprep.mubr.msk.f32.mxu1 %vm1717_vm0, %v1718_v8  ;;  %v1474_v2 = vpack.c.bf16 %v860_v62, %v859_v61  ;;  %v1477_v5 = vpack.c.bf16 %v862_v4, %v861_v3  ;;  %v947_v6 = vld [vmem:[#allocation8] sm:$0xff]  ;;  %v949_v10 = vld [vmem:[#allocation10] sm:$0xff]  ;;  %v950_v11 = vld [vmem:[#allocation10 + $0x8] sm:$0xff] }
  0x7b   :  { %1443 = vmatprep.subr.bf16.mxu1 %v1716_v1  ;;  %v1486_v9 = vpack.c.bf16 %v948_v7, %v947_v6  ;;  %v951_v12 = vld [vmem:[#allocation10 + $0x10] sm:$0xff]  ;;  %v1480_v13 = vpack.c.bf16 %v950_v11, %v949_v10  ;;  %v952_v14 = vld [vmem:[#allocation10 + $0x18] sm:$0xff] }
  0x7c   :  { %v1483_v15 = vpack.c.bf16 %v952_v14, %v951_v12  ;;  %v1218_v23 = vld [vmem:[%s2062_s7] ss:$0 sm:$0xff]  ;;  %v1228_v31 = vld [vmem:[%s2062_s7 + $0x1] ss:$0 sm:$0xff] }
  0xee   :  { %v135_v24 = vpop.permute.xlu0 %134 }
  0xef   :  { %vm136_vm2 = vcmp.eq.s32.totalorder %v132_v21, %v135_v24 }
  0xf0   :  { %v1213_v28 = vsel %vm136_vm2, 1.0, %v1718_v8 }
  0xf1   :  { %1310 = vmatmul.mubr.msk.f32.vlgmr.msra.gmra.mrb[0].mxu0 %vm143_vm1, %v1213_v28 }
  0xf2   :  { %1451 = vmatpush3.bf16.msra.mxu0 %v1450_v25  ;;  %1349 = vmatprep.mubr.msk.f32.mxu0 %vm1717_vm0, %v1718_v8 }
  0xf3   :  { %1452 = vmatprep.subr.bf16.mxu0 %v1716_v1 }
  0xf6   :  { %1454 = vmatpush3.bf16.msra.mxu0 %v1453_v29 }
  0xf7   :  { %1458 = vmatprep.subr.bf16.mxu0 %v1716_v1 }
  0xf9   :  { %1350 = vmatmul.mubr.msk.f32.vlgmr.msra.gmra.mrb[2].mxu0 %vm143_vm1, %v1920_v18 }
  0xfa   :  { %1460 = vmatpush3.bf16.msra.mxu0 %v1459_v32  ;;  %1367 = vmatprep.mubr.msk.f32.mxu0 %vm1717_vm0, %v1718_v8 }
  0xfb   :  { %1461 = vmatprep.subr.bf16.mxu0 %v1716_v1 }
  0xfe   :  { %1463 = vmatpush3.bf16.msra.mxu0 %v1462_v35 }
  0xff   :  { %1470 = vmatprep.subr.bf16.mxu0 %v1716_v1 }
 0x101   :  { %1368 = vmatmul.mubr.msk.f32.vlgmr.msra.gmra.mrb[4].mxu0 %vm143_vm1, %v1953_v38 }
 0x102   :  { %1472 = vmatpush3.bf16.msra.mxu0 %v1471_v39  ;;  %1385 = vmatprep.mubr.msk.f32.mxu0 %vm1717_vm0, %v1718_v8 }
 0x103   :  { %1479 = vmatprep.subr.bf16.mxu0 %v1716_v1 }
 0x14c   :  { %v1961_v40 = vpop.f32.mrb[0].mxu1 }
 0x14d   :  { %v1322_v41 = vpop.f32.mrb[1].mxu1 }
 0x1c4   :  { %v213_v47 = vpop.f32.mrb[0].mxu0 }
 0x1c5   :  { %v1311_v48 = vpop.f32.mrb[1].mxu0  ;;  %1328 = vmatmul.mubr.msk.f32.vlgmr.msra.gmra.mrb[2].mxu1 %vm296_vm3, %v213_v47  ;;  %1386 = vmatmul.mubr.msk.f32.vlgmr.msra.gmra.mrb[6].mxu0 %vm296_vm3, %v213_v47 }
 0x1c6   :  { %1445 = vmatpush3.bf16.msra.mxu1 %v1444_v44  ;;  %1338 = vmatprep.mubr.msk.f32.mxu1 %vm1717_vm0, %v1718_v8  ;;  %v1238_v44 = vld [vmem:[%s2063_s8] ss:$0 sm:$0xff] }
 0x1c7   :  { %1446 = vmatprep.subr.bf16.mxu1 %v1716_v1  ;;  %1407 = vmatprep.mubr.msk.f32.mxu0 %vm1717_vm0, %v1718_v8 }
 0x1c8   :  { %1481 = vmatpush3.bf16.msra.mxu0 %v1480_v13 }
 0x1c9   :  { %1482 = vmatprep.subr.bf16.mxu0 %v1716_v1 }
 0x1ca   :  { %1448 = vmatpush3.bf16.msra.mxu1 %v1447_v49  ;;  %v1237_v49 = vld [vmem:[%s2062_s7 + $0x2] ss:$0 sm:$0xff]  ;;  %s1719_s7 = smov [#allocation14]  }
 0x1cb   :  { %1455 = vmatprep.subr.bf16.mxu1 %v1716_v1  ;;  %s1197_s8 = sshll.u32 %s1719_s7, 4  ;;  %s1198_s8 = int_to_ptr.vmem [resolvable:$true] %s1197_s8 }
 0x1cc   :  { %v536_v55 = vpop.f32.mrb[2].mxu0  ;;  %1484 = vmatpush3.bf16.msra.mxu0 %v1483_v15  ;;  %s1651_s19 = scalar_lea.vmem %s1198_s8, 128  ;;  %p1656_p7 = scmp.lt.s32.totalorder %s1198_s8, %s1198_s8 }
 0x1cd   :  { %1339 = vmatmul.mubr.msk.f32.vlgmr.msra.gmra.mrb[4].mxu1 %vm143_vm1, %v1953_v38  ;;  %v1351_v56 = vpop.f32.mrb[3].mxu0  ;;  %1488 = vmatprep.subr.bf16.mxu0 %v1716_v1  ;;  %p1652_p6 = scmp.ne.s32.totalorder %s1198_s8, %s1651_s19  ;;  %p1657_p8 = scmp.lt.s32.totalorder %s1651_s19, %s1651_s19 }
 0x1ce   :  { %1457 = vmatpush3.bf16.msra.mxu1 %v1456_v52  ;;  %1356 = vmatprep.mubr.msk.f32.mxu1 %vm1717_vm0, %v1718_v8  ;;  %v1096_v56 = vld [vmem:[#allocation11] sm:$0xff] }
 0x1cf   :  { %1464 = vmatprep.subr.bf16.mxu1 %v1716_v1  ;;  %p1658_p9 = por %p1657_p8, %p1656_p7 }
 0x1d1   :  { %1357 = vmatmul.mubr.msk.f32.vlgmr.msra.gmra.mrb[6].mxu1 %vm296_vm3, %v213_v47  ;;  %p1659_p10 = pnand %p1658_p9, %p1652_p6 }
 0x1d2   :  { %1466 = vmatpush3.bf16.msra.mxu1 %v1465_v57  ;;  %1378 = vmatprep.mubr.msk.f32.mxu1 %vm1717_vm0, %v1718_v8  ;;  %v1097_v57 = vld [vmem:[#allocation11 + $0x8] sm:$0xff] }
 0x1d3   :  { %1467 = vmatprep.subr.bf16.mxu1 %v1716_v1  ;;  %v1489_v61 = vpack.c.bf16 %v1097_v57, %v1096_v56 }
 0x1d4   :  { %v681_v63 = vpop.f32.mrb[4].mxu0 }
 0x1d5   :  { %v1369_v0 = vpop.f32.mrb[5].mxu0 }
 0x1d6   :  { %1469 = vmatpush3.bf16.msra.mxu1 %v1468_v60  ;;  %v1099_v0 = vld [vmem:[#allocation11 + $0x18] sm:$0xff] }
 0x1d7   :  { %1473 = vmatprep.subr.bf16.mxu1 %v1716_v1 }
 0x1d9   :  { %1379 = vmatmul.mubr.msk.f32.vlgmr.msra.gmra.mrb[8].mxu1 %vm143_vm1, %v1920_v18 }
 0x1da   :  { %1475 = vmatpush3.bf16.msra.mxu1 %v1474_v2  ;;  %1396 = vmatprep.mubr.msk.f32.mxu1 %vm1717_vm0, %v1718_v8 }
 0x1db   :  { %1476 = vmatprep.subr.bf16.mxu1 %v1716_v1 }
 0x1de   :  { %1478 = vmatpush3.bf16.msra.mxu1 %v1477_v5 }
 0x1df   :  { %1485 = vmatprep.subr.bf16.mxu1 %v1716_v1 }
 0x1e1   :  { %1397 = vmatmul.mubr.msk.f32.vlgmr.msra.gmra.mrb[10].mxu1 %vm143_vm1, %v1953_v38 }
 0x1e2   :  { %1487 = vmatpush3.bf16.msra.mxu1 %v1486_v9  ;;  %1414 = vmatprep.mubr.msk.f32.mxu1 %vm1717_vm0, %v1718_v8 }
 0x1e5   :  { %1415 = vmatmul.mubr.msk.f32.vlgmr.msra.gmra.mrb[12].mxu1 %vm296_vm3, %v213_v47 }
 0x298   :  { %v366_v16 = vpop.f32.mrb[2].mxu1  ;;  %v845_v17 = vpop.f32.mrb[6].mxu0 }
 0x299   :  { %v367_v19 = vadd.f32 %v366_v16, %v1961_v40  ;;  %v1329_v20 = vpop.f32.mrb[3].mxu1  ;;  %v1387_v21 = vpop.f32.mrb[7].mxu0 }
 0x2a0   :  { %v443_v22 = vpop.f32.mrb[4].mxu1 }
 0x2a1   :  { %v447_v24 = vadd.f32 %v443_v22, %v367_v19  ;;  %v1340_v25 = vpop.f32.mrb[5].mxu1 }
 0x2a3   :  { %v455_v26 = vadd.f32 %v1218_v23, %v447_v24 }
 0x2a4   :  { %v606_v27 = vpop.f32.mrb[6].mxu1 }
 0x2a5   :  { %v1219_v28 = vmul.f32 -1.442695, %v455_v26  ;;  %v607_v29 = vadd.f32 %v606_v27, %v536_v55  ;;  %v1358_v30 = vpop.f32.mrb[7].mxu1 }
 0x2a7   :  { %1509 = vpow2.f32 %v1219_v28  ;;  %v685_v32 = vadd.f32 %v681_v63, %v607_v29  ;;  %v1098_v63 = vld [vmem:[#allocation11 + $0x10] sm:$0xff] }
 0x2a8   :  { %v1492_v2 = vpack.c.bf16 %v1099_v0, %v1098_v63 }
 0x2a9   :  { %v694_v33 = vadd.f32 %v1228_v31, %v685_v32 }
 0x2ab   :  { %v1229_v34 = vmul.f32 -1.442695, %v694_v33 }
 0x2ac   :  { %v775_v35 = vpop.f32.mrb[8].mxu1 }
 0x2ad   :  { %v846_v36 = vadd.f32 %v845_v17, %v775_v35  ;;  %v1380_v37 = vpop.f32.mrb[9].mxu1  ;;  %1511 = vpow2.f32 %v1229_v34 }
 0x2af   :  { %v857_v51 = vadd.f32 %v1237_v49, %v846_v36 }
 0x2b1   :  { %v1510_v39 = vpop.eup %1509 }
 0x2b2   :  { %v459_v40 = vadd.f32 1.0, %v1510_v39 }
 0x2b4   :  { %1513 = vrcp.f32 %v459_v40  ;;  %v936_v41 = vpop.f32.mrb[10].mxu1 }
 0x2b5   :  { %v1398_v42 = vpop.f32.mrb[11].mxu1  ;;  %v937_v48 = vadd.f32 %v1238_v44, %v936_v41 }
 0x2b7   :  { %v1512_v43 = vpop.eup %1511 }
 0x2b8   :  { %v1092_v45 = vpop.f32.mrb[12].mxu1  ;;  %v698_v47 = vadd.f32 1.0, %v1512_v43 }
 0x2b9   :  { %v1416_v46 = vpop.f32.mrb[13].mxu1 }
 0x2ba   :  { %1515 = vrcp.f32 %v698_v47 }
 0x2be   :  { %v1514_v50 = vpop.eup %1513 }
 0x2bf   :  { %v940_v52 = vmul.f32 %v1514_v50, %v937_v48 }
 0x2c1   :  { %v941_v53 = vadd.f32 %v940_v52, %v857_v51 }
 0x2c3   :  { %1517 = vtanh.f32 %v941_v53 }
 0x2c4   :  { %v1516_v54 = vpop.eup %1515 }
 0x2c5   :  { %v943_v55 = vsub.f32 1.0, %v1516_v54  ;;  %v945_v60 = vmul.f32 %v1516_v54, %v1953_v38 }
 0x2cd   :  { %v1518_v58 = vpop.eup %1517 }
 0x2ce   :  { %v944_v59 = vmul.f32 %v1518_v58, %v943_v55 }
 0x2d0   :  { %v946_v62 = vadd.f32 %v945_v60, %v944_v59 }
 0x2d2   :  { %1408 = vmatmul.mubr.msk.f32.vlgmr.msra.gmra.mrb[8].mxu0 %vm143_vm1, %v946_v62  ;;  %1180 = vst.msk [vmem:[#allocation14] sm:$0xff] %vm143_vm1, %v946_v62 }
 0x2d3   :  { %1490 = vmatpush3.bf16.msra.mxu0 %v1489_v61  ;;  %1425 = vmatprep.mubr.msk.f32.mxu0 %vm1717_vm0, %v1718_v8 }
 0x2d4   :  { %1491 = vmatprep.subr.bf16.mxu0 %v1716_v1 }
 0x2d7   :  { %1493 = vmatpush3.bf16.msra.mxu0 %v1492_v2 }
 0x2da   :  { %1426 = vmatmul.mubr.msk.f32.vlgmr.msra.gmra.mrb[10].mxu0 %vm143_vm1, %v1920_v18 }
 0x2db   :  { %1662 = shalt.err (!%p1659_p10)
}
 0x2dc   :  { %s1663_s28 = scalar_lea.hbm %s2069_s14, 128 }
 0x2dd   :  { %p1664_p11 = scmp.ne.s32.totalorder %s2069_s14, %s1663_s28  ;;  %p1667_p12 = scmp.lt.u32.totalorder %s1663_s28, %s2069_s14 }
 0x2df   :  { %p1669_p13 = pnand %p1667_p12, %p1664_p11 }
 0x2e1   :  { %1672 = shalt.err (!%p1669_p13)
}
 0x2e2   :  { %1200 = dma.vmem_to_hbm [thread:$0]  %s1198_s8, 128, %s2069_s14, [#allocation15]   ;;  %v1243_v3 = vld [vmem:[%s2067_s12] ss:$0 sm:$0xff] }
 0x2e3   :  { %s1720_s25 = smov [#allocation13]  }
 0x2e4   :  { %s1187_s26 = sshll.u32 %s1720_s25, 4  ;;  %s1188_s26 = int_to_ptr.vmem [resolvable:$true] %s1187_s26 }
 0x2e5   :  { %s1673_s27 = scalar_lea.vmem %s1188_s26, 128  ;;  %p1678_p1 = scmp.lt.s32.totalorder %s1188_s26, %s1188_s26 }
 0x2e6   :  { %p1674_p0 = scmp.ne.s32.totalorder %s1188_s26, %s1673_s27  ;;  %p1679_p2 = scmp.lt.s32.totalorder %s1673_s27, %s1673_s27 }
 0x2e8   :  { %p1680_p3 = por %p1679_p2, %p1678_p1 }
 0x2ea   :  { %p1681_p4 = pnand %p1680_p3, %p1674_p0 }
 0x3a5   :  { %v1022_v1 = vpop.f32.mrb[8].mxu0 }
 0x3a6   :  { %v1093_v8 = vadd.f32 %v1092_v45, %v1022_v1  ;;  %v1409_v18 = vpop.f32.mrb[9].mxu0 }
 0x3ad   :  { %v1166_v38 = vpop.f32.mrb[10].mxu0 }
 0x3ae   :  { %v1170_v4 = vadd.f32 %v1166_v38, %v1093_v8  ;;  %v1427_v5 = vpop.f32.mrb[11].mxu0 }
 0x3b0   :  { %v1178_v6 = vadd.f32 %v1243_v3, %v1170_v4 }
 0x3b2   :  { %1179 = vst.msk [vmem:[#allocation13] sm:$0xff] %vm143_vm1, %v1178_v6 }
 0x3b3   :  { %1684 = shalt.err (!%p1681_p4)
}
 0x3b4   :  { %s1685_s22 = scalar_lea.hbm %s2068_s13, 128 }
 0x3b5   :  { %p1686_p5 = scmp.ne.s32.totalorder %s2068_s13, %s1685_s22  ;;  %p1689_p6 = scmp.lt.u32.totalorder %s1685_s22, %s2068_s13 }
 0x3b7   :  { %p1691_p7 = pnand %p1689_p6, %p1686_p5 }
 0x3b9   :  { %1694 = shalt.err (!%p1691_p7)
}
 0x3ba   :  { %1190 = dma.vmem_to_hbm [thread:$0]  %s1188_s26, 128, %s2068_s13, [#allocation4]  }
 0x3bb   :  { %1703 = dma.done.wait [#allocation4], 128  }
 0x3bc   :  { %1704 = vsyncadd [#allocation4], 4294967168 }
 0x3bd   :  { %1705 = dma.done.wait [#allocation15], 128  }
 0x3be   :  { %1706 = vsyncadd [#allocation15], 4294967168 }
 0x3bf   :  { %1207 = vsyncpa [#allocation3], 1 }
 0x3c0   :  { %1208 = vsyncpa [#allocation6], 1 }
 0x3c1   :  { %1209 = vsyncpa [#allocation9], 1 }
 0x3c2   :  { %1210 = vsyncpa [#allocation12], 1 }
 0x3c3   :  { %1211 = vsyncpa [#allocation4], 1 }
 0x3c4   :  { %1212 = vsyncpa [#allocation15], 1 }

</bundles_post_ra>
